<compile_context>
chip_gen: v6e
topology: v6e:2x2x1
jax: 0.10.0
libtpu: 0.0.40
codegen_flags: <defaults>
</compile_context>

<pallas_src>
import jax
import jax.numpy as jnp
from jax.experimental import pallas as pl
from jax.experimental.pallas import tpu as pltpu


def _round_up(x, m):
    return ((x + m - 1) // m) * m


def _cdiv(a, b):
    return (a + b - 1) // b


def _make_kernel(TB, TL, TD, n_tail):
    """Builds the kernel with all tile extents baked in as Python constants."""

    def kernel(x_ref, w_ref, b_ref, o_ref, acc_ref):
        # x_ref  : (TB, TL, TD)  input tile (VMEM)
        # w_ref  : (TL, 1)       conv-weight column for this L tile (VMEM, f32)
        # b_ref  : (1,)          conv bias (SMEM, f32)
        # o_ref  : (TB, TD)      output tile
        # acc_ref: (TB, TD)      f32 accumulator, persists across the L grid axis
        li = pl.program_id(2)
        nl = pl.num_programs(2)

        @pl.when(li == 0)
        def _init():
            acc_ref[...] = jnp.zeros_like(acc_ref)

        def accumulate(n_rows):
            # Lane-broadcast the weight column once per grid step (hoisted out of the
            # per-row loop: JAX does not CSE broadcast_in_dim).
            w_bc = jnp.broadcast_to(w_ref[:n_rows, :], (n_rows, TD)).astype(jnp.float32)
            # Static loop over the batch rows of this tile.  Every x access is a dense,
            # statically sliced (n_rows, TD) tile (full-tile vlds), the weighted sum over
            # doc positions is a VALU multiply + sublane (XLU) reduce, and the VMEM
            # accumulator is read-modify-written once per row per grid step.
            for b in range(TB):
                xb = x_ref[b, :n_rows, :].astype(jnp.float32)            # (n_rows, TD)
                contrib = jnp.sum(xb * w_bc, axis=0, keepdims=True)      # (1, TD)
                acc_ref[b:b + 1, :] = acc_ref[b:b + 1, :] + contrib

        # Non-tail L blocks: all TL rows are valid.
        @pl.when(li < nl - 1)
        def _full():
            accumulate(TL)

        # Tail L block: only the first n_tail rows hold real data (the rest of the block
        # buffer is undefined and never read); add the bias and emit the output tile.
        @pl.when(li == nl - 1)
        def _tail():
            accumulate(n_tail)
            o_ref[...] = (acc_ref[...] + b_ref[0]).astype(o_ref.dtype)

    return kernel


def global_attention(x, conv_weight, conv_bias):
    """x: (B, L, D); conv_weight: (1, 1, L, 1) (PyTorch Conv2d layout); conv_bias: (1,).

    Returns (B, D) in x.dtype (bf16 in -> bf16 out; the PyTorch module would keep f32).
    # TODO(synk): PyTorch's .squeeze() would also drop the batch dim when bsz == 1;
    # we always return (B, D) (cosmetic difference only).
    """
    B, L, D = x.shape
    w = conv_weight.reshape(L, 1).astype(jnp.float32)
    b = conv_bias.reshape(1).astype(jnp.float32)

    itemsize = x.dtype.itemsize
    pack = {4: 8, 2: 16, 1: 32}.get(itemsize, 8)      # sublane packing of the input dtype

    # ---- tile sizing -------------------------------------------------------
    # L tile: small so the in-kernel unroll / live vregs stay bounded; always a multiple
    # of the dtype's sublane packing (16 for f32/bf16, 32 for int8/fp8-sized dtypes).
    TL = max(16, pack)
    TL = min(TL, _round_up(L, pack))
    # D tile: the full D when it fits the per-row vreg budget, otherwise a 128-multiple
    # tile (adds a second "parallel" grid axis and caps the f32 accumulator size).
    TD = D if D <= 512 else 512
    # B tile: targets ~2 MiB x blocks (double buffered comfortably inside even v7x's
    # 64 MiB VMEM), capped so the traced per-row loop stays small.  No overshoot: the
    # block bytes are clamped directly.
    target_block_bytes = 2 * 1024 * 1024
    row_bytes = TL * TD * itemsize
    TB = max(8, min(128, (target_block_bytes // row_bytes) // 8 * 8))
    TB = min(TB, _round_up(B, 8))

    nb = _cdiv(B, TB)
    nd = _cdiv(D, TD)
    nl = _cdiv(L, TL)
    n_tail = L - (nl - 1) * TL

    grid = (nb, nd, nl)                               # reduction (L) axis last

    kernel = _make_kernel(TB, TL, TD, n_tail)

    out = pl.pallas_call(
        kernel,
        out_shape=jax.ShapeDtypeStruct((B, D), x.dtype),
        grid=grid,
        in_specs=[
            pl.BlockSpec((TB, TL, TD), lambda bi, di, li: (bi, li, di)),   # x tile
            pl.BlockSpec((TL, 1), lambda bi, di, li: (li, 0)),             # weight column
            pl.BlockSpec(memory_space=pltpu.MemorySpace.SMEM),             # bias scalar
        ],
        out_specs=pl.BlockSpec((TB, TD), lambda bi, di, li: (bi, di)),
        scratch_shapes=[pltpu.VMEM((TB, TD), jnp.float32)],
        compiler_params=pltpu.CompilerParams(
            dimension_semantics=("parallel", "parallel", "arbitrary"),
            vmem_limit_bytes=32 * 1024 * 1024,
        ),
    )(x, w, b)
    return out


if __name__ == "__main__":
    # Small shapes consistent with the module: bsz=2, max_doc_len=8, word_embed_dim=32.
    B, L, D = 2, 8, 32

    key = jax.random.PRNGKey(0)
    kx, kw, kb = jax.random.split(key, 3)

    x = jax.random.normal(kx, (B, L, D), dtype=jnp.float32)

    # Deterministic Conv2d(1, 1, kernel_size=(L, 1)) parameters (PyTorch-style uniform
    # init, fan_in = in_channels * kH * kW = L).
    bound = 1.0 / float(L) ** 0.5
    conv_weight = jax.random.uniform(kw, (1, 1, L, 1), dtype=jnp.float32,
                                     minval=-bound, maxval=bound)
    conv_bias = jax.random.uniform(kb, (1,), dtype=jnp.float32,
                                   minval=-bound, maxval=bound)

    out = global_attention(x, conv_weight, conv_bias)
    out = jax.block_until_ready(out)

    # Pure-JAX reference of the conv-as-weighted-sum semantics.
    ref = jnp.einsum("bld,l->bd", x, conv_weight.reshape(L)) + conv_bias[0]

    assert out.shape == (B, D), out.shape
    assert jnp.allclose(out, ref, atol=1e-5, rtol=1e-5), "mismatch vs reference"

    print("KERNEL_OK")
</pallas_src>

<mosaic_0001>
module attributes {stable_mosaic.version = 11 : i64} {
  func.func @kernel(%arg0: i32, %arg1: i32, %arg2: i32, %arg3: memref<8x8x32xf32, #tpu.memory_space<vmem>>, %arg4: memref<8x1xf32, #tpu.memory_space<vmem>>, %arg5: memref<1xf32, #tpu.memory_space<smem>>, %arg6: memref<8x32xf32, #tpu.memory_space<vmem>>, %arg7: memref<8x32xf32, #tpu.memory_space<vmem>>) attributes {dimension_semantics = [#tpu.dimension_semantics<parallel>, #tpu.dimension_semantics<parallel>, #tpu.dimension_semantics<arbitrary>], iteration_bounds = array<i64: 1, 1, 1>, scalar_prefetch = 0 : i64, scratch_operands = 1 : i64, tpu.core_type = #tpu.core_type<tc>, window_params = [{transform_indices = @transform_0, window_bounds = array<i64: 8, 8, 32>}, {transform_indices = @transform_1, window_bounds = array<i64: 8, 1>}, {transform_indices = @transform_2, window_bounds = array<i64: 1>}, {transform_indices = @transform_3, window_bounds = array<i64: 8, 32>}]} {
    %c0_i32 = arith.constant 0 : i32
    %0 = arith.cmpi eq, %arg2, %c0_i32 : i32
    %1 = arith.extui %0 : i1 to i32
    %c0_i32_0 = arith.constant 0 : i32
    %2 = arith.cmpi ne, %1, %c0_i32_0 : i32
    scf.if %2 {
      %cst = arith.constant 0.000000e+00 : f32
      %9 = vector.broadcast %cst : f32 to vector<8x32xf32>
      %c0 = arith.constant 0 : index
      %c0_5 = arith.constant 0 : index
      %10 = vector.load %arg7[%c0, %c0_5] : memref<8x32xf32, #tpu.memory_space<vmem>>, vector<8x32xf32>
      tpu.vector_store %arg7[%c0, %c0_5], %9 {strides = array<i32>} : memref<8x32xf32, #tpu.memory_space<vmem>>, vector<8x32xf32>,
    } else {
    }
    %c0_i32_1 = arith.constant 0 : i32
    %3 = arith.cmpi slt, %arg2, %c0_i32_1 : i32
    %4 = arith.extui %3 : i1 to i32
    %c0_i32_2 = arith.constant 0 : i32
    %5 = arith.cmpi ne, %4, %c0_i32_2 : i32
    scf.if %5 {
      %c0 = arith.constant 0 : index
      %c0_5 = arith.constant 0 : index
      %9 = vector.load %arg4[%c0, %c0_5] : memref<8x1xf32, #tpu.memory_space<vmem>>, vector<8x1xf32>
      %10 = vector.shape_cast %9 : vector<8x1xf32> to vector<8x1xf32>
      %11 = vector.broadcast %10 : vector<8x1xf32> to vector<8x32xf32>
      %c0_6 = arith.constant 0 : index
      %c0_7 = arith.constant 0 : index
      %c0_8 = arith.constant 0 : index
      %12 = vector.load %arg3[%c0_6, %c0_7, %c0_8] : memref<8x8x32xf32, #tpu.memory_space<vmem>>, vector<1x8x32xf32>
      %13 = vector.shape_cast %12 : vector<1x8x32xf32> to vector<8x32xf32>
      %14 = arith.mulf %13, %11 : vector<8x32xf32>
      %cst = arith.constant dense<0.000000e+00> : vector<32xf32>
      %15 = vector.multi_reduction <add>, %14, %cst [0] : vector<8x32xf32> to vector<32xf32>
      %16 = vector.shape_cast %15 : vector<32xf32> to vector<1x32xf32>
      %c0_9 = arith.constant 0 : index
      %c0_10 = arith.constant 0 : index
      %17 = vector.load %arg7[%c0_9, %c0_10] : memref<8x32xf32, #tpu.memory_space<vmem>>, vector<1x32xf32>
      %18 = arith.addf %17, %16 : vector<1x32xf32>
      %c0_11 = arith.constant 0 : index
      %c0_12 = arith.constant 0 : index
      %19 = vector.load %arg7[%c0_11, %c0_12] : memref<8x32xf32, #tpu.memory_space<vmem>>, vector<1x32xf32>
      tpu.vector_store %arg7[%c0_11, %c0_12], %18 {strides = array<i32>} : memref<8x32xf32, #tpu.memory_space<vmem>>, vector<1x32xf32>,
      %c1 = arith.constant 1 : index
      %c0_13 = arith.constant 0 : index
      %c0_14 = arith.constant 0 : index
      %20 = vector.load %arg3[%c1, %c0_13, %c0_14] : memref<8x8x32xf32, #tpu.memory_space<vmem>>, vector<1x8x32xf32>
      %21 = vector.shape_cast %20 : vector<1x8x32xf32> to vector<8x32xf32>
      %22 = arith.mulf %21, %11 : vector<8x32xf32>
      %cst_15 = arith.constant dense<0.000000e+00> : vector<32xf32>
      %23 = vector.multi_reduction <add>, %22, %cst_15 [0] : vector<8x32xf32> to vector<32xf32>
      %24 = vector.shape_cast %23 : vector<32xf32> to vector<1x32xf32>
      %c1_16 = arith.constant 1 : index
      %c0_17 = arith.constant 0 : index
      %25 = vector.load %arg7[%c1_16, %c0_17] : memref<8x32xf32, #tpu.memory_space<vmem>>, vector<1x32xf32>
      %26 = arith.addf %25, %24 : vector<1x32xf32>
      %c1_18 = arith.constant 1 : index
      %c0_19 = arith.constant 0 : index
      %27 = vector.load %arg7[%c1_18, %c0_19] : memref<8x32xf32, #tpu.memory_space<vmem>>, vector<1x32xf32>
      tpu.vector_store %arg7[%c1_18, %c0_19], %26 {strides = array<i32>} : memref<8x32xf32, #tpu.memory_space<vmem>>, vector<1x32xf32>,
      %c2 = arith.constant 2 : index
      %c0_20 = arith.constant 0 : index
      %c0_21 = arith.constant 0 : index
      %28 = vector.load %arg3[%c2, %c0_20, %c0_21] : memref<8x8x32xf32, #tpu.memory_space<vmem>>, vector<1x8x32xf32>
      %29 = vector.shape_cast %28 : vector<1x8x32xf32> to vector<8x32xf32>
      %30 = arith.mulf %29, %11 : vector<8x32xf32>
      %cst_22 = arith.constant dense<0.000000e+00> : vector<32xf32>
      %31 = vector.multi_reduction <add>, %30, %cst_22 [0] : vector<8x32xf32> to vector<32xf32>
      %32 = vector.shape_cast %31 : vector<32xf32> to vector<1x32xf32>
      %c2_23 = arith.constant 2 : index
      %c0_24 = arith.constant 0 : index
      %33 = vector.load %arg7[%c2_23, %c0_24] : memref<8x32xf32, #tpu.memory_space<vmem>>, vector<1x32xf32>
      %34 = arith.addf %33, %32 : vector<1x32xf32>
      %c2_25 = arith.constant 2 : index
      %c0_26 = arith.constant 0 : index
      %35 = vector.load %arg7[%c2_25, %c0_26] : memref<8x32xf32, #tpu.memory_space<vmem>>, vector<1x32xf32>
      tpu.vector_store %arg7[%c2_25, %c0_26], %34 {strides = array<i32>} : memref<8x32xf32, #tpu.memory_space<vmem>>, vector<1x32xf32>,
      %c3 = arith.constant 3 : index
      %c0_27 = arith.constant 0 : index
      %c0_28 = arith.constant 0 : index
      %36 = vector.load %arg3[%c3, %c0_27, %c0_28] : memref<8x8x32xf32, #tpu.memory_space<vmem>>, vector<1x8x32xf32>
      %37 = vector.shape_cast %36 : vector<1x8x32xf32> to vector<8x32xf32>
      %38 = arith.mulf %37, %11 : vector<8x32xf32>
      %cst_29 = arith.constant dense<0.000000e+00> : vector<32xf32>
      %39 = vector.multi_reduction <add>, %38, %cst_29 [0] : vector<8x32xf32> to vector<32xf32>
      %40 = vector.shape_cast %39 : vector<32xf32> to vector<1x32xf32>
      %c3_30 = arith.constant 3 : index
      %c0_31 = arith.constant 0 : index
      %41 = vector.load %arg7[%c3_30, %c0_31] : memref<8x32xf32, #tpu.memory_space<vmem>>, vector<1x32xf32>
      %42 = arith.addf %41, %40 : vector<1x32xf32>
      %c3_32 = arith.constant 3 : index
      %c0_33 = arith.constant 0 : index
      %43 = vector.load %arg7[%c3_32, %c0_33] : memref<8x32xf32, #tpu.memory_space<vmem>>, vector<1x32xf32>
      tpu.vector_store %arg7[%c3_32, %c0_33], %42 {strides = array<i32>} : memref<8x32xf32, #tpu.memory_space<vmem>>, vector<1x32xf32>,
      %c4 = arith.constant 4 : index
      %c0_34 = arith.constant 0 : index
      %c0_35 = arith.constant 0 : index
      %44 = vector.load %arg3[%c4, %c0_34, %c0_35] : memref<8x8x32xf32, #tpu.memory_space<vmem>>, vector<1x8x32xf32>
      %45 = vector.shape_cast %44 : vector<1x8x32xf32> to vector<8x32xf32>
      %46 = arith.mulf %45, %11 : vector<8x32xf32>
      %cst_36 = arith.constant dense<0.000000e+00> : vector<32xf32>
      %47 = vector.multi_reduction <add>, %46, %cst_36 [0] : vector<8x32xf32> to vector<32xf32>
      %48 = vector.shape_cast %47 : vector<32xf32> to vector<1x32xf32>
      %c4_37 = arith.constant 4 : index
      %c0_38 = arith.constant 0 : index
      %49 = vector.load %arg7[%c4_37, %c0_38] : memref<8x32xf32, #tpu.memory_space<vmem>>, vector<1x32xf32>
      %50 = arith.addf %49, %48 : vector<1x32xf32>
      %c4_39 = arith.constant 4 : index
      %c0_40 = arith.constant 0 : index
      %51 = vector.load %arg7[%c4_39, %c0_40] : memref<8x32xf32, #tpu.memory_space<vmem>>, vector<1x32xf32>
      tpu.vector_store %arg7[%c4_39, %c0_40], %50 {strides = array<i32>} : memref<8x32xf32, #tpu.memory_space<vmem>>, vector<1x32xf32>,
      %c5 = arith.constant 5 : index
      %c0_41 = arith.constant 0 : index
      %c0_42 = arith.constant 0 : index
      %52 = vector.load %arg3[%c5, %c0_41, %c0_42] : memref<8x8x32xf32, #tpu.memory_space<vmem>>, vector<1x8x32xf32>
      %53 = vector.shape_cast %52 : vector<1x8x32xf32> to vector<8x32xf32>
      %54 = arith.mulf %53, %11 : vector<8x32xf32>
      %cst_43 = arith.constant dense<0.000000e+00> : vector<32xf32>
      %55 = vector.multi_reduction <add>, %54, %cst_43 [0] : vector<8x32xf32> to vector<32xf32>
      %56 = vector.shape_cast %55 : vector<32xf32> to vector<1x32xf32>
      %c5_44 = arith.constant 5 : index
      %c0_45 = arith.constant 0 : index
      %57 = vector.load %arg7[%c5_44, %c0_45] : memref<8x32xf32, #tpu.memory_space<vmem>>, vector<1x32xf32>
      %58 = arith.addf %57, %56 : vector<1x32xf32>
      %c5_46 = arith.constant 5 : index
      %c0_47 = arith.constant 0 : index
      %59 = vector.load %arg7[%c5_46, %c0_47] : memref<8x32xf32, #tpu.memory_space<vmem>>, vector<1x32xf32>
      tpu.vector_store %arg7[%c5_46, %c0_47], %58 {strides = array<i32>} : memref<8x32xf32, #tpu.memory_space<vmem>>, vector<1x32xf32>,
      %c6 = arith.constant 6 : index
      %c0_48 = arith.constant 0 : index
      %c0_49 = arith.constant 0 : index
      %60 = vector.load %arg3[%c6, %c0_48, %c0_49] : memref<8x8x32xf32, #tpu.memory_space<vmem>>, vector<1x8x32xf32>
      %61 = vector.shape_cast %60 : vector<1x8x32xf32> to vector<8x32xf32>
      %62 = arith.mulf %61, %11 : vector<8x32xf32>
      %cst_50 = arith.constant dense<0.000000e+00> : vector<32xf32>
      %63 = vector.multi_reduction <add>, %62, %cst_50 [0] : vector<8x32xf32> to vector<32xf32>
      %64 = vector.shape_cast %63 : vector<32xf32> to vector<1x32xf32>
      %c6_51 = arith.constant 6 : index
      %c0_52 = arith.constant 0 : index
      %65 = vector.load %arg7[%c6_51, %c0_52] : memref<8x32xf32, #tpu.memory_space<vmem>>, vector<1x32xf32>
      %66 = arith.addf %65, %64 : vector<1x32xf32>
      %c6_53 = arith.constant 6 : index
      %c0_54 = arith.constant 0 : index
      %67 = vector.load %arg7[%c6_53, %c0_54] : memref<8x32xf32, #tpu.memory_space<vmem>>, vector<1x32xf32>
      tpu.vector_store %arg7[%c6_53, %c0_54], %66 {strides = array<i32>} : memref<8x32xf32, #tpu.memory_space<vmem>>, vector<1x32xf32>,
      %c7 = arith.constant 7 : index
      %c0_55 = arith.constant 0 : index
      %c0_56 = arith.constant 0 : index
      %68 = vector.load %arg3[%c7, %c0_55, %c0_56] : memref<8x8x32xf32, #tpu.memory_space<vmem>>, vector<1x8x32xf32>
      %69 = vector.shape_cast %68 : vector<1x8x32xf32> to vector<8x32xf32>
      %70 = arith.mulf %69, %11 : vector<8x32xf32>
      %cst_57 = arith.constant dense<0.000000e+00> : vector<32xf32>
      %71 = vector.multi_reduction <add>, %70, %cst_57 [0] : vector<8x32xf32> to vector<32xf32>
      %72 = vector.shape_cast %71 : vector<32xf32> to vector<1x32xf32>
      %c7_58 = arith.constant 7 : index
      %c0_59 = arith.constant 0 : index
      %73 = vector.load %arg7[%c7_58, %c0_59] : memref<8x32xf32, #tpu.memory_space<vmem>>, vector<1x32xf32>
      %74 = arith.addf %73, %72 : vector<1x32xf32>
      %c7_60 = arith.constant 7 : index
      %c0_61 = arith.constant 0 : index
      %75 = vector.load %arg7[%c7_60, %c0_61] : memref<8x32xf32, #tpu.memory_space<vmem>>, vector<1x32xf32>
      tpu.vector_store %arg7[%c7_60, %c0_61], %74 {strides = array<i32>} : memref<8x32xf32, #tpu.memory_space<vmem>>, vector<1x32xf32>,
    } else {
    }
    %c0_i32_3 = arith.constant 0 : i32
    %6 = arith.cmpi eq, %arg2, %c0_i32_3 : i32
    %7 = arith.extui %6 : i1 to i32
    %c0_i32_4 = arith.constant 0 : i32
    %8 = arith.cmpi ne, %7, %c0_i32_4 : i32
    scf.if %8 {
      %c0 = arith.constant 0 : index
      %c0_5 = arith.constant 0 : index
      %9 = vector.load %arg4[%c0, %c0_5] : memref<8x1xf32, #tpu.memory_space<vmem>>, vector<8x1xf32>
      %10 = vector.shape_cast %9 : vector<8x1xf32> to vector<8x1xf32>
      %11 = vector.broadcast %10 : vector<8x1xf32> to vector<8x32xf32>
      %c0_6 = arith.constant 0 : index
      %c0_7 = arith.constant 0 : index
      %c0_8 = arith.constant 0 : index
      %12 = vector.load %arg3[%c0_6, %c0_7, %c0_8] : memref<8x8x32xf32, #tpu.memory_space<vmem>>, vector<1x8x32xf32>
      %13 = vector.shape_cast %12 : vector<1x8x32xf32> to vector<8x32xf32>
      %14 = arith.mulf %13, %11 : vector<8x32xf32>
      %cst = arith.constant dense<0.000000e+00> : vector<32xf32>
      %15 = vector.multi_reduction <add>, %14, %cst [0] : vector<8x32xf32> to vector<32xf32>
      %16 = vector.shape_cast %15 : vector<32xf32> to vector<1x32xf32>
      %c0_9 = arith.constant 0 : index
      %c0_10 = arith.constant 0 : index
      %17 = vector.load %arg7[%c0_9, %c0_10] : memref<8x32xf32, #tpu.memory_space<vmem>>, vector<1x32xf32>
      %18 = arith.addf %17, %16 : vector<1x32xf32>
      %c0_11 = arith.constant 0 : index
      %c0_12 = arith.constant 0 : index
      %19 = vector.load %arg7[%c0_11, %c0_12] : memref<8x32xf32, #tpu.memory_space<vmem>>, vector<1x32xf32>
      tpu.vector_store %arg7[%c0_11, %c0_12], %18 {strides = array<i32>} : memref<8x32xf32, #tpu.memory_space<vmem>>, vector<1x32xf32>,
      %c1 = arith.constant 1 : index
      %c0_13 = arith.constant 0 : index
      %c0_14 = arith.constant 0 : index
      %20 = vector.load %arg3[%c1, %c0_13, %c0_14] : memref<8x8x32xf32, #tpu.memory_space<vmem>>, vector<1x8x32xf32>
      %21 = vector.shape_cast %20 : vector<1x8x32xf32> to vector<8x32xf32>
      %22 = arith.mulf %21, %11 : vector<8x32xf32>
      %cst_15 = arith.constant dense<0.000000e+00> : vector<32xf32>
      %23 = vector.multi_reduction <add>, %22, %cst_15 [0] : vector<8x32xf32> to vector<32xf32>
      %24 = vector.shape_cast %23 : vector<32xf32> to vector<1x32xf32>
      %c1_16 = arith.constant 1 : index
      %c0_17 = arith.constant 0 : index
      %25 = vector.load %arg7[%c1_16, %c0_17] : memref<8x32xf32, #tpu.memory_space<vmem>>, vector<1x32xf32>
      %26 = arith.addf %25, %24 : vector<1x32xf32>
      %c1_18 = arith.constant 1 : index
      %c0_19 = arith.constant 0 : index
      %27 = vector.load %arg7[%c1_18, %c0_19] : memref<8x32xf32, #tpu.memory_space<vmem>>, vector<1x32xf32>
      tpu.vector_store %arg7[%c1_18, %c0_19], %26 {strides = array<i32>} : memref<8x32xf32, #tpu.memory_space<vmem>>, vector<1x32xf32>,
      %c2 = arith.constant 2 : index
      %c0_20 = arith.constant 0 : index
      %c0_21 = arith.constant 0 : index
      %28 = vector.load %arg3[%c2, %c0_20, %c0_21] : memref<8x8x32xf32, #tpu.memory_space<vmem>>, vector<1x8x32xf32>
      %29 = vector.shape_cast %28 : vector<1x8x32xf32> to vector<8x32xf32>
      %30 = arith.mulf %29, %11 : vector<8x32xf32>
      %cst_22 = arith.constant dense<0.000000e+00> : vector<32xf32>
      %31 = vector.multi_reduction <add>, %30, %cst_22 [0] : vector<8x32xf32> to vector<32xf32>
      %32 = vector.shape_cast %31 : vector<32xf32> to vector<1x32xf32>
      %c2_23 = arith.constant 2 : index
      %c0_24 = arith.constant 0 : index
      %33 = vector.load %arg7[%c2_23, %c0_24] : memref<8x32xf32, #tpu.memory_space<vmem>>, vector<1x32xf32>
      %34 = arith.addf %33, %32 : vector<1x32xf32>
      %c2_25 = arith.constant 2 : index
      %c0_26 = arith.constant 0 : index
      %35 = vector.load %arg7[%c2_25, %c0_26] : memref<8x32xf32, #tpu.memory_space<vmem>>, vector<1x32xf32>
      tpu.vector_store %arg7[%c2_25, %c0_26], %34 {strides = array<i32>} : memref<8x32xf32, #tpu.memory_space<vmem>>, vector<1x32xf32>,
      %c3 = arith.constant 3 : index
      %c0_27 = arith.constant 0 : index
      %c0_28 = arith.constant 0 : index
      %36 = vector.load %arg3[%c3, %c0_27, %c0_28] : memref<8x8x32xf32, #tpu.memory_space<vmem>>, vector<1x8x32xf32>
      %37 = vector.shape_cast %36 : vector<1x8x32xf32> to vector<8x32xf32>
      %38 = arith.mulf %37, %11 : vector<8x32xf32>
      %cst_29 = arith.constant dense<0.000000e+00> : vector<32xf32>
      %39 = vector.multi_reduction <add>, %38, %cst_29 [0] : vector<8x32xf32> to vector<32xf32>
      %40 = vector.shape_cast %39 : vector<32xf32> to vector<1x32xf32>
      %c3_30 = arith.constant 3 : index
      %c0_31 = arith.constant 0 : index
      %41 = vector.load %arg7[%c3_30, %c0_31] : memref<8x32xf32, #tpu.memory_space<vmem>>, vector<1x32xf32>
      %42 = arith.addf %41, %40 : vector<1x32xf32>
      %c3_32 = arith.constant 3 : index
      %c0_33 = arith.constant 0 : index
      %43 = vector.load %arg7[%c3_32, %c0_33] : memref<8x32xf32, #tpu.memory_space<vmem>>, vector<1x32xf32>
      tpu.vector_store %arg7[%c3_32, %c0_33], %42 {strides = array<i32>} : memref<8x32xf32, #tpu.memory_space<vmem>>, vector<1x32xf32>,
      %c4 = arith.constant 4 : index
      %c0_34 = arith.constant 0 : index
      %c0_35 = arith.constant 0 : index
      %44 = vector.load %arg3[%c4, %c0_34, %c0_35] : memref<8x8x32xf32, #tpu.memory_space<vmem>>, vector<1x8x32xf32>
      %45 = vector.shape_cast %44 : vector<1x8x32xf32> to vector<8x32xf32>
      %46 = arith.mulf %45, %11 : vector<8x32xf32>
      %cst_36 = arith.constant dense<0.000000e+00> : vector<32xf32>
      %47 = vector.multi_reduction <add>, %46, %cst_36 [0] : vector<8x32xf32> to vector<32xf32>
      %48 = vector.shape_cast %47 : vector<32xf32> to vector<1x32xf32>
      %c4_37 = arith.constant 4 : index
      %c0_38 = arith.constant 0 : index
      %49 = vector.load %arg7[%c4_37, %c0_38] : memref<8x32xf32, #tpu.memory_space<vmem>>, vector<1x32xf32>
      %50 = arith.addf %49, %48 : vector<1x32xf32>
      %c4_39 = arith.constant 4 : index
      %c0_40 = arith.constant 0 : index
      %51 = vector.load %arg7[%c4_39, %c0_40] : memref<8x32xf32, #tpu.memory_space<vmem>>, vector<1x32xf32>
      tpu.vector_store %arg7[%c4_39, %c0_40], %50 {strides = array<i32>} : memref<8x32xf32, #tpu.memory_space<vmem>>, vector<1x32xf32>,
      %c5 = arith.constant 5 : index
      %c0_41 = arith.constant 0 : index
      %c0_42 = arith.constant 0 : index
      %52 = vector.load %arg3[%c5, %c0_41, %c0_42] : memref<8x8x32xf32, #tpu.memory_space<vmem>>, vector<1x8x32xf32>
      %53 = vector.shape_cast %52 : vector<1x8x32xf32> to vector<8x32xf32>
      %54 = arith.mulf %53, %11 : vector<8x32xf32>
      %cst_43 = arith.constant dense<0.000000e+00> : vector<32xf32>
      %55 = vector.multi_reduction <add>, %54, %cst_43 [0] : vector<8x32xf32> to vector<32xf32>
      %56 = vector.shape_cast %55 : vector<32xf32> to vector<1x32xf32>
      %c5_44 = arith.constant 5 : index
      %c0_45 = arith.constant 0 : index
      %57 = vector.load %arg7[%c5_44, %c0_45] : memref<8x32xf32, #tpu.memory_space<vmem>>, vector<1x32xf32>
      %58 = arith.addf %57, %56 : vector<1x32xf32>
      %c5_46 = arith.constant 5 : index
      %c0_47 = arith.constant 0 : index
      %59 = vector.load %arg7[%c5_46, %c0_47] : memref<8x32xf32, #tpu.memory_space<vmem>>, vector<1x32xf32>
      tpu.vector_store %arg7[%c5_46, %c0_47], %58 {strides = array<i32>} : memref<8x32xf32, #tpu.memory_space<vmem>>, vector<1x32xf32>,
      %c6 = arith.constant 6 : index
      %c0_48 = arith.constant 0 : index
      %c0_49 = arith.constant 0 : index
      %60 = vector.load %arg3[%c6, %c0_48, %c0_49] : memref<8x8x32xf32, #tpu.memory_space<vmem>>, vector<1x8x32xf32>
      %61 = vector.shape_cast %60 : vector<1x8x32xf32> to vector<8x32xf32>
      %62 = arith.mulf %61, %11 : vector<8x32xf32>
      %cst_50 = arith.constant dense<0.000000e+00> : vector<32xf32>
      %63 = vector.multi_reduction <add>, %62, %cst_50 [0] : vector<8x32xf32> to vector<32xf32>
      %64 = vector.shape_cast %63 : vector<32xf32> to vector<1x32xf32>
      %c6_51 = arith.constant 6 : index
      %c0_52 = arith.constant 0 : index
      %65 = vector.load %arg7[%c6_51, %c0_52] : memref<8x32xf32, #tpu.memory_space<vmem>>, vector<1x32xf32>
      %66 = arith.addf %65, %64 : vector<1x32xf32>
      %c6_53 = arith.constant 6 : index
      %c0_54 = arith.constant 0 : index
      %67 = vector.load %arg7[%c6_53, %c0_54] : memref<8x32xf32, #tpu.memory_space<vmem>>, vector<1x32xf32>
      tpu.vector_store %arg7[%c6_53, %c0_54], %66 {strides = array<i32>} : memref<8x32xf32, #tpu.memory_space<vmem>>, vector<1x32xf32>,
      %c7 = arith.constant 7 : index
      %c0_55 = arith.constant 0 : index
      %c0_56 = arith.constant 0 : index
      %68 = vector.load %arg3[%c7, %c0_55, %c0_56] : memref<8x8x32xf32, #tpu.memory_space<vmem>>, vector<1x8x32xf32>
      %69 = vector.shape_cast %68 : vector<1x8x32xf32> to vector<8x32xf32>
      %70 = arith.mulf %69, %11 : vector<8x32xf32>
      %cst_57 = arith.constant dense<0.000000e+00> : vector<32xf32>
      %71 = vector.multi_reduction <add>, %70, %cst_57 [0] : vector<8x32xf32> to vector<32xf32>
      %72 = vector.shape_cast %71 : vector<32xf32> to vector<1x32xf32>
      %c7_58 = arith.constant 7 : index
      %c0_59 = arith.constant 0 : index
      %73 = vector.load %arg7[%c7_58, %c0_59] : memref<8x32xf32, #tpu.memory_space<vmem>>, vector<1x32xf32>
      %74 = arith.addf %73, %72 : vector<1x32xf32>
      %c7_60 = arith.constant 7 : index
      %c0_61 = arith.constant 0 : index
      %75 = vector.load %arg7[%c7_60, %c0_61] : memref<8x32xf32, #tpu.memory_space<vmem>>, vector<1x32xf32>
      tpu.vector_store %arg7[%c7_60, %c0_61], %74 {strides = array<i32>} : memref<8x32xf32, #tpu.memory_space<vmem>>, vector<1x32xf32>,
      %c0_62 = arith.constant 0 : index
      %c0_63 = arith.constant 0 : index
      %76 = vector.load %arg7[%c0_62, %c0_63] : memref<8x32xf32, #tpu.memory_space<vmem>>, vector<8x32xf32>
      %c0_64 = arith.constant 0 : index
      %77 = memref.load %arg5[%c0_64] : memref<1xf32, #tpu.memory_space<smem>>
      %78 = vector.broadcast %77 : f32 to vector<8x32xf32>
      %79 = arith.addf %76, %78 : vector<8x32xf32>
      %c0_65 = arith.constant 0 : index
      %c0_66 = arith.constant 0 : index
      %80 = vector.load %arg6[%c0_65, %c0_66] : memref<8x32xf32, #tpu.memory_space<vmem>>, vector<8x32xf32>
      tpu.vector_store %arg6[%c0_65, %c0_66], %79 {strides = array<i32>} : memref<8x32xf32, #tpu.memory_space<vmem>>, vector<8x32xf32>,
    } else {
    }
    return
  }
  func.func @transform_0(%arg0: i32, %arg1: i32, %arg2: i32) -> (i32, i32, i32) {
    %c0_i32 = arith.constant 0 : i32
    return %arg0, %arg2, %arg1 : i32, i32, i32
  }
  func.func @transform_1(%arg0: i32, %arg1: i32, %arg2: i32) -> (i32, i32) {
    %c0_i32 = arith.constant 0 : i32
    %c0_i32_0 = arith.constant 0 : i32
    return %arg2, %c0_i32 : i32, i32
  }
  func.func @transform_2(%arg0: i32, %arg1: i32, %arg2: i32) -> i32 {
    %c0_i32 = arith.constant 0 : i32
    %c0_i32_0 = arith.constant 0 : i32
    return %c0_i32 : i32
  }
  func.func @transform_3(%arg0: i32, %arg1: i32, %arg2: i32) -> (i32, i32) {
    %c0_i32 = arith.constant 0 : i32
    return %arg0, %arg1 : i32, i32
  }
}

</mosaic_0001>

<bundles_post_ra>
// kernel: tpu_custom_call.1
= control target key start
LH: loop header
LB: loop body
LE: loop exit
PB: predicated region body
PF: predicated region fallthrough
CT: control target
= control target key end

     0   :  { %9 = vsyncpa [#allocation5], 0  ;;  %s398_s0 = inlined_call_operand.hbm [shape: f32[2,8,32], index: 0, kind: input, shape index: {}]   ;;  %s399_s1 = inlined_call_operand.vmem [shape: f32[8,1], index: 1, kind: input, shape index: {}]   ;;  %s400_s2 = inlined_call_operand.<no memory space> [shape: f32[1], index: 2, kind: input, shape index: {}]   ;;  %s401_s3 = inlined_call_operand.hbm [shape: f32[2,32], index: 3, kind: output, shape index: {}]  }
   0x1   :  { %10 = vsyncpa [#allocation6], 0 }
   0x2   :  { %15 = vsyncadd [#allocation5], 768  ;;  %s340_s12 = smov [#allocation4]  }
   0x3   :  { %s16_s13 = sshll.u32 %s340_s12, 4  ;;  %s17_s13 = int_to_ptr.vmem [resolvable:$true] %s16_s13 }
   0x4   :  { %s304_s14 = scalar_lea.vmem %s17_s13, 256  ;;  %s308_s15 = scalar_lea.vmem %s17_s13, 1024 }
   0x5   :  { %p305_p0 = scmp.ne.s32.totalorder %s17_s13, %s304_s14  ;;  %p309_p1 = scmp.lt.s32.totalorder %s17_s13, %s17_s13 }
   0x6   :  { %p310_p2 = scmp.lt.s32.totalorder %s308_s15, %s304_s14 }
   0x8   :  { %p311_p3 = por %p310_p2, %p309_p1 }
   0xa   :  { %p312_p4 = pnand %p311_p3, %p305_p0 }
   0xc   :  { %315 = shalt.err (!%p312_p4)
}
   0xd   :  { %s341_s16 = smov 128   ;;  %s342_s17 = smov 8  }
   0xe   :  { %22 = dma.hbm_to_vmem [thread:$0]  %s398_s0, 256, %s17_s13, [#allocation5], %s341_s16, %s341_s16, %s342_s17  }
   0xf   :  { %336 = dma.done.wait [#allocation5], 1024  }
  0x10   :  { %337 = vsyncadd [#allocation5], 4294966272  ;;  %vm34_vm0 = vcmask 261120   ;;  %v343_v0 = vmov 0   ;;  %v344_v1 = vmov 0.0   ;;  %v154_v2 = vld [vmem:[%s399_s1] sm:$0xff] }
  0x11   :  { %295 = vset.pattern.permute.xlu0 %v343_v0  ;;  %35 = vst.msk [vmem:[#allocation2] sm:$0xff] %vm34_vm0, %v344_v1  ;;  %v160_v3 = vld [vmem:[#allocation4] sm:$0xff]  ;;  %v175_v4 = vld [vmem:[#allocation4 + $0x8] sm:$0xff]  ;;  %v188_v5 = vld [vmem:[#allocation4 + $0x10] sm:$0xff]  ;;  %vm172_vm1 = vcmask 253952  }
  0x12   :  { %157 = vperm.xlu0 %295, %v154_v2   ;;  %v201_v6 = vld [vmem:[#allocation4 + $0x18] sm:$0xff]  ;;  %v214_v7 = vld [vmem:[#allocation4 + $0x20] sm:$0xff]  ;;  %v227_v8 = vld [vmem:[#allocation4 + $0x28] sm:$0xff] }
  0x13   :  { %v240_v9 = vld [vmem:[#allocation4 + $0x30] sm:$0xff]  ;;  %v253_v10 = vld [vmem:[#allocation4 + $0x38] sm:$0xff] }
  0x18   :  { %v170_v57 = vld [vmem:[#allocation2] sm:$0x1]  ;;  %v184_v61 = vld [vmem:[#allocation2 + $0x1] sm:$0x1]  ;;  %v197_v62 = vld [vmem:[#allocation2 + $0x2] sm:$0x1] }
  0x19   :  { %v210_v63 = vld [vmem:[#allocation2 + $0x3] sm:$0x1] }
  0x8d   :  { %v158_v11 = vpop.permute.xlu0 %157 }
  0x8e   :  { %v161_v12 = vmul.f32 %v160_v3, %v158_v11  ;;  %v176_v13 = vmul.f32 %v175_v4, %v158_v11  ;;  %v189_v14 = vmul.f32 %v188_v5, %v158_v11  ;;  %v202_v15 = vmul.f32 %v201_v6, %v158_v11 }
  0x8f   :  { %v215_v16 = vmul.f32 %v214_v7, %v158_v11  ;;  %v228_v17 = vmul.f32 %v227_v8, %v158_v11  ;;  %v241_v18 = vmul.f32 %v240_v9, %v158_v11  ;;  %v254_v19 = vmul.f32 %v253_v10, %v158_v11  ;;  %v223_v9 = vld [vmem:[#allocation2 + $0x4] sm:$0x1] }
  0x90   :  { %v163_v20 = vsel %vm34_vm0, %v161_v12, 0.0  ;;  %v177_v21 = vsel %vm34_vm0, %v176_v13, 0.0  ;;  %v190_v22 = vsel %vm34_vm0, %v189_v14, 0.0  ;;  %v203_v23 = vsel %vm34_vm0, %v202_v15, 0.0 }
  0x91   :  { %v164_v24 = vrot.slane %v163_v20, 4  ;;  %v178_v25 = vrot.slane %v177_v21, 4  ;;  %v191_v26 = vrot.slane %v190_v22, 4  ;;  %v204_v27 = vrot.slane %v203_v23, 4 }
  0x92   :  { %v216_v28 = vsel %vm34_vm0, %v215_v16, 0.0  ;;  %v229_v29 = vsel %vm34_vm0, %v228_v17, 0.0  ;;  %v242_v30 = vsel %vm34_vm0, %v241_v18, 0.0  ;;  %v255_v31 = vsel %vm34_vm0, %v254_v19, 0.0  ;;  %v236_v17 = vld [vmem:[#allocation2 + $0x5] sm:$0x1] }
  0x93   :  { %v165_v32 = vadd.f32 %v164_v24, %v163_v20  ;;  %v179_v33 = vadd.f32 %v178_v25, %v177_v21  ;;  %v192_v34 = vadd.f32 %v191_v26, %v190_v22  ;;  %v205_v35 = vadd.f32 %v204_v27, %v203_v23  ;;  %v249_v18 = vld [vmem:[#allocation2 + $0x6] sm:$0x1]  ;;  %v262_v19 = vld [vmem:[#allocation2 + $0x7] sm:$0x1] }
  0x94   :  { %v217_v36 = vrot.slane %v216_v28, 4  ;;  %v230_v37 = vrot.slane %v229_v29, 4  ;;  %v243_v38 = vrot.slane %v242_v30, 4  ;;  %v256_v39 = vrot.slane %v255_v31, 4 }
  0x95   :  { %v166_v40 = vrot.slane %v165_v32, 2  ;;  %v180_v41 = vrot.slane %v179_v33, 2  ;;  %v193_v42 = vrot.slane %v192_v34, 2  ;;  %v206_v43 = vrot.slane %v205_v35, 2 }
  0x96   :  { %v218_v44 = vadd.f32 %v217_v36, %v216_v28  ;;  %v231_v45 = vadd.f32 %v230_v37, %v229_v29  ;;  %v244_v46 = vadd.f32 %v243_v38, %v242_v30  ;;  %v257_v47 = vadd.f32 %v256_v39, %v255_v31 }
  0x97   :  { %v167_v48 = vadd.f32 %v166_v40, %v165_v32  ;;  %v181_v49 = vadd.f32 %v180_v41, %v179_v33  ;;  %v194_v50 = vadd.f32 %v193_v42, %v192_v34  ;;  %v207_v51 = vadd.f32 %v206_v43, %v205_v35 }
  0x98   :  { %v219_v52 = vrot.slane %v218_v44, 2  ;;  %v232_v53 = vrot.slane %v231_v45, 2  ;;  %v245_v54 = vrot.slane %v244_v46, 2  ;;  %v258_v55 = vrot.slane %v257_v47, 2 }
  0x99   :  { %v168_v56 = vrot.slane %v167_v48, 1  ;;  %v182_v58 = vrot.slane %v181_v49, 1  ;;  %v195_v59 = vrot.slane %v194_v50, 1  ;;  %v208_v60 = vrot.slane %v207_v51, 1 }
  0x9a   :  { %v220_v0 = vadd.f32 %v219_v52, %v218_v44  ;;  %v233_v1 = vadd.f32 %v232_v53, %v231_v45  ;;  %v246_v2 = vadd.f32 %v245_v54, %v244_v46  ;;  %v259_v3 = vadd.f32 %v258_v55, %v257_v47 }
  0x9b   :  { %v169_v4 = vadd.f32 %v168_v56, %v167_v48  ;;  %v183_v5 = vadd.f32 %v182_v58, %v181_v49  ;;  %v196_v6 = vadd.f32 %v195_v59, %v194_v50  ;;  %v209_v7 = vadd.f32 %v208_v60, %v207_v51 }
  0x9c   :  { %v221_v8 = vrot.slane %v220_v0, 1  ;;  %v234_v10 = vrot.slane %v233_v1, 1  ;;  %v247_v11 = vrot.slane %v246_v2, 1  ;;  %v260_v12 = vrot.slane %v259_v3, 1 }
  0x9d   :  { %v171_v13 = vadd.f32 %v170_v57, %v169_v4  ;;  %v185_v14 = vadd.f32 %v184_v61, %v183_v5  ;;  %v198_v15 = vadd.f32 %v197_v62, %v196_v6  ;;  %v211_v16 = vadd.f32 %v210_v63, %v209_v7 }
  0x9e   :  { %v222_v20 = vadd.f32 %v221_v8, %v220_v0  ;;  %v235_v21 = vadd.f32 %v234_v10, %v233_v1  ;;  %v248_v22 = vadd.f32 %v247_v11, %v246_v2  ;;  %v261_v23 = vadd.f32 %v260_v12, %v259_v3 }
  0x9f   :  { %173 = vst.msk [vmem:[#allocation2] sm:$0x1] %vm172_vm1, %v171_v13  ;;  %186 = vst.msk [vmem:[#allocation2 + $0x1] sm:$0x1] %vm172_vm1, %v185_v14  ;;  %v267_v28 = vstv %s400_s2 }
  0xa0   :  { %199 = vst.msk [vmem:[#allocation2 + $0x2] sm:$0x1] %vm172_vm1, %v198_v15  ;;  %212 = vst.msk [vmem:[#allocation2 + $0x3] sm:$0x1] %vm172_vm1, %v211_v16  ;;  %v224_v24 = vadd.f32 %v223_v9, %v222_v20  ;;  %v237_v25 = vadd.f32 %v236_v17, %v235_v21  ;;  %v250_v26 = vadd.f32 %v249_v18, %v248_v22 }
  0xa1   :  { %v263_v27 = vadd.f32 %v262_v19, %v261_v23 }
  0xa2   :  { %225 = vst.msk [vmem:[#allocation2 + $0x4] sm:$0x1] %vm172_vm1, %v224_v24  ;;  %238 = vst.msk [vmem:[#allocation2 + $0x5] sm:$0x1] %vm172_vm1, %v237_v25 }
  0xa3   :  { %251 = vst.msk [vmem:[#allocation2 + $0x6] sm:$0x1] %vm172_vm1, %v250_v26  ;;  %264 = vst.msk [vmem:[#allocation2 + $0x7] sm:$0x1] %vm172_vm1, %v263_v27 }
  0xaa   :  { %v265_v29 = vld [vmem:[#allocation2] sm:$0xff] }
  0xab   :  { %v268_v30 = vadd.f32 %v267_v28, %v265_v29 }
  0xad   :  { %269 = vst.msk [vmem:[#allocation7] sm:$0xff] %vm34_vm0, %v268_v30 }
  0xae   :  { %274 = vsyncadd [#allocation6], 96  ;;  %s345_s22 = smov [#allocation7]  }
  0xaf   :  { %s275_s23 = sshll.u32 %s345_s22, 4  ;;  %s276_s23 = int_to_ptr.vmem [resolvable:$true] %s275_s23 }
  0xb0   :  { %s316_s24 = scalar_lea.vmem %s276_s23, 32  ;;  %s320_s25 = scalar_lea.vmem %s276_s23, 128 }
  0xb1   :  { %p317_p5 = scmp.ne.s32.totalorder %s276_s23, %s316_s24  ;;  %p321_p6 = scmp.lt.s32.totalorder %s276_s23, %s276_s23 }
  0xb2   :  { %p322_p7 = scmp.lt.s32.totalorder %s320_s25, %s316_s24 }
  0xb4   :  { %p323_p8 = por %p322_p7, %p321_p6 }
  0xb6   :  { %p324_p9 = pnand %p323_p8, %p317_p5 }
  0xb8   :  { %327 = shalt.err (!%p324_p9)
}
  0xb9   :  { %s346_s26 = smov 32   ;;  %s347_s27 = smov 2  }
  0xba   :  { %281 = dma.vmem_to_hbm [thread:$0]  %s276_s23, 32, %s401_s3, [#allocation6], %s346_s26, %s346_s26, %s347_s27  }
  0xbb   :  { %338 = dma.done.wait [#allocation6], 128  }
  0xbc   :  { %339 = vsyncadd [#allocation6], 4294967168 }
  0xbd   :  { %285 = vsyncpa [#allocation5], 1 }
  0xbe   :  { %286 = vsyncpa [#allocation6], 1 }

</bundles_post_ra>
